<compile_context>
chip_gen: v5e
topology: v5e:2x2
jax: 0.10.0
libtpu: 0.0.40
codegen_flags: <defaults>
</compile_context>

<pallas_src>
import numpy as np
import jax
import jax.numpy as jnp
from jax.experimental import pallas as pl
from jax.experimental.pallas import tpu as pltpu

BN_EPS = 1e-5


# ---------------------------------------------------------------------------
# fused kernel: conv stack + BN + ReLU + FC (theta) + seasonality projection
# ---------------------------------------------------------------------------
def _make_kernel(num_layers, batch, length):
    LB = batch * length

    def kernel(*refs):
        # refs: x_slab, (w, b, gamma, beta) * num_layers, wfc, s_cat, h_out, proj_out
        x_ref = refs[0]
        conv_refs = refs[1:1 + 4 * num_layers]
        wfc_ref, scat_ref = refs[1 + 4 * num_layers:3 + 4 * num_layers]
        h_ref, proj_ref = refs[-2:]

        h = x_ref[...]                                    # (L*B, Cin) slab, row = l*B + b

        for i in range(num_layers):
            w_ref = conv_refs[4 * i]                      # (3, Cin, Cout)
            bias = conv_refs[4 * i + 1][...]              # (1, Cout)
            gamma = conv_refs[4 * i + 2][...]             # (1, Cout)
            beta = conv_refs[4 * i + 3][...]              # (1, Cout)

            cin = h.shape[1]
            zrow = jnp.zeros((batch, cin), jnp.float32)
            # left / right neighbours along l (rows shift by B); zero pad at l=0 / l=L-1.
            x_m1 = jnp.concatenate([zrow, h[:LB - batch, :]], axis=0)
            x_p1 = jnp.concatenate([h[batch:, :], zrow], axis=0)

            y = (jnp.dot(x_m1, w_ref[0], preferred_element_type=jnp.float32)
                 + jnp.dot(h,    w_ref[1], preferred_element_type=jnp.float32)
                 + jnp.dot(x_p1, w_ref[2], preferred_element_type=jnp.float32)
                 + bias)                                  # (L*B, Cout)

            # BatchNorm1d, training mode: per-channel stats over (batch, length),
            # biased variance, centered two-pass (avoids E[x^2]-E[x]^2 cancellation).
            mean = jnp.mean(y, axis=0, keepdims=True)     # (1, Cout)
            d = y - mean
            var = jnp.mean(d * d, axis=0, keepdims=True)  # (1, Cout)
            inv = jax.lax.rsqrt(var + BN_EPS)
            h = jnp.maximum(d * inv * gamma + beta, 0.0)  # ReLU

        h_ref[...] = h                                    # (L*B, C1) slab store

        # theta = flatten(h) @ W_fc^T ; realised as L matmuls with a B-row LHS,
        # accumulated in f32.  theta_b == theta_f (shared FC weight in the module).
        T = wfc_ref.shape[-1]
        theta = jnp.zeros((batch, T), jnp.float32)
        for l in range(length):
            theta = theta + jnp.dot(h[l * batch:(l + 1) * batch, :],   # (B, C1)
                                    wfc_ref[l],                        # (C1, T)
                                    preferred_element_type=jnp.float32)

        # single projection against the concatenated [S_back | S_fore] basis
        proj_ref[...] = jnp.dot(theta, scat_ref[...],
                                preferred_element_type=jnp.float32)    # (B, Lb+Lf)

    return kernel


# ---------------------------------------------------------------------------
# glue: basis construction, parameter init, pallas_call wrapper
# ---------------------------------------------------------------------------
def linear_space(backcast_length, forecast_length):
    ls = np.arange(-backcast_length, forecast_length, 1) / forecast_length
    b_ls = np.abs(np.flip(ls[:backcast_length]))
    f_ls = ls[backcast_length:]
    return b_ls, f_ls


def seasonality_basis(thetas_dim, t):
    p = thetas_dim
    p1, p2 = (p // 2, p // 2) if p % 2 == 0 else (p // 2, p // 2 + 1)
    s1 = np.stack([np.cos(2 * np.pi * i * t) for i in range(p1)])
    s2 = np.stack([np.sin(2 * np.pi * i * t) for i in range(p2)])
    return jnp.asarray(np.concatenate([s1, s2], axis=0), dtype=jnp.float32)  # (p, len(t))


def init_params(key, backcast_length, channels, kernels, thetas_dim, num_layers_cnn):
    c0, c1 = channels
    keys = jax.random.split(key, 2 * num_layers_cnn + 1)
    conv = []
    cin = c0
    for i in range(num_layers_cnn):
        w = jax.random.normal(keys[2 * i], (kernels, cin, c1), jnp.float32) * 0.1
        b = jax.random.normal(keys[2 * i + 1], (1, c1), jnp.float32) * 0.1
        conv.append({
            'w': w, 'b': b,
            'gamma': jnp.ones((1, c1), jnp.float32),
            'beta': jnp.zeros((1, c1), jnp.float32),
        })
        cin = c1
    # PyTorch-style Linear weight: (thetas_dim, backcast_length * channels[1]),
    # flat index ordering is channel-major (c * L + l), matching h.flatten(1).
    fc_w = jax.random.normal(keys[-1], (thetas_dim, backcast_length * c1),
                             jnp.float32) * 0.05
    return {'conv': conv, 'fc_w': fc_w}


def seasonality_block_forward(x_ncl, params, s_back, s_fore):
    """x_ncl: (B, C0, L) float32 (PyTorch NCL).  Returns (h (B,C1,L), backcast, forecast)."""
    B, _, L = x_ncl.shape
    conv_params = params['conv']
    num_layers = len(conv_params)
    C1 = conv_params[0]['w'].shape[-1]
    W_fc = params['fc_w']                       # (T, C1*L), PyTorch flatten order
    T = W_fc.shape[0]
    Lb = s_back.shape[1]
    Lf = s_fore.shape[1]

    # x slab with row index = l*B + b, channels last: x_slab[l*B+b, c] = x[b, c, l]
    x_slab = jnp.transpose(x_ncl, (2, 0, 1)).reshape(L * B, -1).astype(jnp.float32)

    # FC weight permuted to the kernel's (l, c) flatten order: wfc[l, c, t] = W_fc[t, c*L + l]
    wfc = jnp.transpose(W_fc.reshape(T, C1, L), (2, 1, 0))   # (L, C1, T)

    # concatenated seasonality basis -> single projection matmul in the kernel
    s_cat = jnp.concatenate([s_back, s_fore], axis=1)        # (T, Lb + Lf)

    args = [x_slab]
    for p in conv_params:
        args += [p['w'], p['b'], p['gamma'], p['beta']]
    args += [wfc, s_cat]

    out_shape = (
        jax.ShapeDtypeStruct((L * B, C1), jnp.float32),      # h slab (row = l*B + b)
        jax.ShapeDtypeStruct((B, Lb + Lf), jnp.float32),     # [backcast | forecast]
    )

    h_slab, proj = pl.pallas_call(
        _make_kernel(num_layers, B, L),
        out_shape=out_shape,
        in_specs=[pl.BlockSpec(memory_space=pltpu.MemorySpace.VMEM)] * len(args),
        out_specs=tuple(pl.BlockSpec(memory_space=pltpu.MemorySpace.VMEM)
                        for _ in range(2)),
    )(*args)

    # back to PyTorch layouts (tiny arrays; pure wrapper-side plumbing)
    h_ncl = jnp.transpose(h_slab.reshape(L, B, C1), (1, 2, 0))   # (B, C1, L)
    backcast = proj[:, :Lb]
    forecast = proj[:, Lb:]
    return h_ncl, backcast, forecast


if __name__ == "__main__":
    # Small, module-consistent shapes.
    backcast_length = 16
    forecast_length = 8
    kernels = 3
    channels = (4, 8)        # (channels[0], channels[1])
    thetas_dim = 6
    num_layers_CNN = 2
    B = 2

    key = jax.random.PRNGKey(0)
    kx, kp = jax.random.split(key)
    x = jax.random.normal(kx, (B, channels[0], backcast_length), jnp.float32)  # NCL

    params = init_params(kp, backcast_length, channels, kernels, thetas_dim,
                         num_layers_CNN)
    b_ls, f_ls = linear_space(backcast_length, forecast_length)
    s_back = seasonality_basis(thetas_dim, b_ls)   # (thetas_dim, backcast_length)
    s_fore = seasonality_basis(thetas_dim, f_ls)   # (thetas_dim, forecast_length)

    h, backcast, forecast = seasonality_block_forward(x, params, s_back, s_fore)
    jax.block_until_ready((h, backcast, forecast))

    assert h.shape == (B, channels[1], backcast_length)
    assert backcast.shape == (B, backcast_length)
    assert forecast.shape == (B, forecast_length)
    assert bool(jnp.all(jnp.isfinite(h)))
    assert bool(jnp.all(jnp.isfinite(backcast)))
    assert bool(jnp.all(jnp.isfinite(forecast)))
    print("KERNEL_OK")
</pallas_src>

<mosaic_0001>
module attributes {stable_mosaic.version = 11 : i64} {
  func.func @kernel(%arg0: memref<32x4xf32, #tpu.memory_space<vmem>>, %arg1: memref<3x4x8xf32, #tpu.memory_space<vmem>>, %arg2: memref<1x8xf32, #tpu.memory_space<vmem>>, %arg3: memref<1x8xf32, #tpu.memory_space<vmem>>, %arg4: memref<1x8xf32, #tpu.memory_space<vmem>>, %arg5: memref<3x8x8xf32, #tpu.memory_space<vmem>>, %arg6: memref<1x8xf32, #tpu.memory_space<vmem>>, %arg7: memref<1x8xf32, #tpu.memory_space<vmem>>, %arg8: memref<1x8xf32, #tpu.memory_space<vmem>>, %arg9: memref<16x8x6xf32, #tpu.memory_space<vmem>>, %arg10: memref<6x24xf32, #tpu.memory_space<vmem>>, %arg11: memref<32x8xf32, #tpu.memory_space<vmem>>, %arg12: memref<2x24xf32, #tpu.memory_space<vmem>>) attributes {dimension_semantics = [], scalar_prefetch = 0 : i64, scratch_operands = 0 : i64, tpu.core_type = #tpu.core_type<tc>} {
    %c0 = arith.constant 0 : index
    %c0_0 = arith.constant 0 : index
    %0 = vector.load %arg0[%c0, %c0_0] : memref<32x4xf32, #tpu.memory_space<vmem>>, vector<32x4xf32>
    %c0_1 = arith.constant 0 : index
    %c0_2 = arith.constant 0 : index
    %1 = vector.load %arg2[%c0_1, %c0_2] : memref<1x8xf32, #tpu.memory_space<vmem>>, vector<1x8xf32>
    %c0_3 = arith.constant 0 : index
    %c0_4 = arith.constant 0 : index
    %2 = vector.load %arg3[%c0_3, %c0_4] : memref<1x8xf32, #tpu.memory_space<vmem>>, vector<1x8xf32>
    %c0_5 = arith.constant 0 : index
    %c0_6 = arith.constant 0 : index
    %3 = vector.load %arg4[%c0_5, %c0_6] : memref<1x8xf32, #tpu.memory_space<vmem>>, vector<1x8xf32>
    %cst = arith.constant 0.000000e+00 : f32
    %4 = vector.broadcast %cst : f32 to vector<2x4xf32>
    %5 = vector.extract_strided_slice %0 {offsets = [0, 0], sizes = [30, 4], strides = [1, 1]} : vector<32x4xf32> to vector<30x4xf32>
    %6 = tpu.concatenate %4, %5 in 0 : vector<2x4xf32>, vector<30x4xf32> -> vector<32x4xf32>
    %7 = vector.extract_strided_slice %0 {offsets = [2, 0], sizes = [30, 4], strides = [1, 1]} : vector<32x4xf32> to vector<30x4xf32>
    %8 = tpu.concatenate %7, %4 in 0 : vector<30x4xf32>, vector<2x4xf32> -> vector<32x4xf32>
    %c0_7 = arith.constant 0 : index
    %c0_8 = arith.constant 0 : index
    %c0_9 = arith.constant 0 : index
    %9 = vector.load %arg1[%c0_7, %c0_8, %c0_9] : memref<3x4x8xf32, #tpu.memory_space<vmem>>, vector<1x4x8xf32>
    %10 = vector.shape_cast %9 : vector<1x4x8xf32> to vector<4x8xf32>
    %cst_10 = arith.constant dense<0.000000e+00> : vector<32x8xf32>
    %11 = tpu.matmul %6, %10, %cst_10 {dimension_numbers = #tpu.dot_dimension_numbers<[1], [0], [0], [1], [0, 0, 1, 1], [], []>} : vector<32x4xf32>, vector<4x8xf32>, vector<32x8xf32> -> vector<32x8xf32>
    %c1 = arith.constant 1 : index
    %c0_11 = arith.constant 0 : index
    %c0_12 = arith.constant 0 : index
    %12 = vector.load %arg1[%c1, %c0_11, %c0_12] : memref<3x4x8xf32, #tpu.memory_space<vmem>>, vector<1x4x8xf32>
    %13 = vector.shape_cast %12 : vector<1x4x8xf32> to vector<4x8xf32>
    %cst_13 = arith.constant dense<0.000000e+00> : vector<32x8xf32>
    %14 = tpu.matmul %0, %13, %cst_13 {dimension_numbers = #tpu.dot_dimension_numbers<[1], [0], [0], [1], [0, 0, 1, 1], [], []>} : vector<32x4xf32>, vector<4x8xf32>, vector<32x8xf32> -> vector<32x8xf32>
    %15 = arith.addf %11, %14 : vector<32x8xf32>
    %c2 = arith.constant 2 : index
    %c0_14 = arith.constant 0 : index
    %c0_15 = arith.constant 0 : index
    %16 = vector.load %arg1[%c2, %c0_14, %c0_15] : memref<3x4x8xf32, #tpu.memory_space<vmem>>, vector<1x4x8xf32>
    %17 = vector.shape_cast %16 : vector<1x4x8xf32> to vector<4x8xf32>
    %cst_16 = arith.constant dense<0.000000e+00> : vector<32x8xf32>
    %18 = tpu.matmul %8, %17, %cst_16 {dimension_numbers = #tpu.dot_dimension_numbers<[1], [0], [0], [1], [0, 0, 1, 1], [], []>} : vector<32x4xf32>, vector<4x8xf32>, vector<32x8xf32> -> vector<32x8xf32>
    %19 = arith.addf %15, %18 : vector<32x8xf32>
    %20 = vector.broadcast %1 : vector<1x8xf32> to vector<32x8xf32>
    %21 = arith.addf %19, %20 : vector<32x8xf32>
    %cst_17 = arith.constant dense<0.000000e+00> : vector<8xf32>
    %22 = vector.multi_reduction <add>, %21, %cst_17 [0] : vector<32x8xf32> to vector<8xf32>
    %23 = vector.shape_cast %22 : vector<8xf32> to vector<1x8xf32>
    %cst_18 = arith.constant 3.200000e+01 : f32
    %24 = vector.broadcast %cst_18 : f32 to vector<1x8xf32>
    %25 = arith.divf %23, %24 : vector<1x8xf32>
    %26 = vector.broadcast %25 : vector<1x8xf32> to vector<32x8xf32>
    %27 = arith.subf %21, %26 : vector<32x8xf32>
    %28 = arith.mulf %27, %27 : vector<32x8xf32>
    %cst_19 = arith.constant dense<0.000000e+00> : vector<8xf32>
    %29 = vector.multi_reduction <add>, %28, %cst_19 [0] : vector<32x8xf32> to vector<8xf32>
    %30 = vector.shape_cast %29 : vector<8xf32> to vector<1x8xf32>
    %cst_20 = arith.constant 3.200000e+01 : f32
    %31 = vector.broadcast %cst_20 : f32 to vector<1x8xf32>
    %32 = arith.divf %30, %31 : vector<1x8xf32>
    %cst_21 = arith.constant 9.99999974E-6 : f32
    %33 = vector.broadcast %cst_21 : f32 to vector<1x8xf32>
    %34 = arith.addf %32, %33 : vector<1x8xf32>
    %35 = math.rsqrt %34 : vector<1x8xf32>
    %36 = vector.broadcast %35 : vector<1x8xf32> to vector<32x8xf32>
    %37 = arith.mulf %27, %36 : vector<32x8xf32>
    %38 = vector.broadcast %2 : vector<1x8xf32> to vector<32x8xf32>
    %39 = arith.mulf %37, %38 : vector<32x8xf32>
    %40 = vector.broadcast %3 : vector<1x8xf32> to vector<32x8xf32>
    %41 = arith.addf %39, %40 : vector<32x8xf32>
    %cst_22 = arith.constant 0.000000e+00 : f32
    %42 = vector.broadcast %cst_22 : f32 to vector<32x8xf32>
    %43 = arith.maximumf %41, %42 : vector<32x8xf32>
    %c0_23 = arith.constant 0 : index
    %c0_24 = arith.constant 0 : index
    %44 = vector.load %arg6[%c0_23, %c0_24] : memref<1x8xf32, #tpu.memory_space<vmem>>, vector<1x8xf32>
    %c0_25 = arith.constant 0 : index
    %c0_26 = arith.constant 0 : index
    %45 = vector.load %arg7[%c0_25, %c0_26] : memref<1x8xf32, #tpu.memory_space<vmem>>, vector<1x8xf32>
    %c0_27 = arith.constant 0 : index
    %c0_28 = arith.constant 0 : index
    %46 = vector.load %arg8[%c0_27, %c0_28] : memref<1x8xf32, #tpu.memory_space<vmem>>, vector<1x8xf32>
    %cst_29 = arith.constant 0.000000e+00 : f32
    %47 = vector.broadcast %cst_29 : f32 to vector<2x8xf32>
    %48 = vector.extract_strided_slice %43 {offsets = [0, 0], sizes = [30, 8], strides = [1, 1]} : vector<32x8xf32> to vector<30x8xf32>
    %49 = tpu.concatenate %47, %48 in 0 : vector<2x8xf32>, vector<30x8xf32> -> vector<32x8xf32>
    %50 = vector.extract_strided_slice %43 {offsets = [2, 0], sizes = [30, 8], strides = [1, 1]} : vector<32x8xf32> to vector<30x8xf32>
    %51 = tpu.concatenate %50, %47 in 0 : vector<30x8xf32>, vector<2x8xf32> -> vector<32x8xf32>
    %c0_30 = arith.constant 0 : index
    %c0_31 = arith.constant 0 : index
    %c0_32 = arith.constant 0 : index
    %52 = vector.load %arg5[%c0_30, %c0_31, %c0_32] : memref<3x8x8xf32, #tpu.memory_space<vmem>>, vector<1x8x8xf32>
    %53 = vector.shape_cast %52 : vector<1x8x8xf32> to vector<8x8xf32>
    %cst_33 = arith.constant dense<0.000000e+00> : vector<32x8xf32>
    %54 = tpu.matmul %49, %53, %cst_33 {dimension_numbers = #tpu.dot_dimension_numbers<[1], [0], [0], [1], [0, 0, 1, 1], [], []>} : vector<32x8xf32>, vector<8x8xf32>, vector<32x8xf32> -> vector<32x8xf32>
    %c1_34 = arith.constant 1 : index
    %c0_35 = arith.constant 0 : index
    %c0_36 = arith.constant 0 : index
    %55 = vector.load %arg5[%c1_34, %c0_35, %c0_36] : memref<3x8x8xf32, #tpu.memory_space<vmem>>, vector<1x8x8xf32>
    %56 = vector.shape_cast %55 : vector<1x8x8xf32> to vector<8x8xf32>
    %cst_37 = arith.constant dense<0.000000e+00> : vector<32x8xf32>
    %57 = tpu.matmul %43, %56, %cst_37 {dimension_numbers = #tpu.dot_dimension_numbers<[1], [0], [0], [1], [0, 0, 1, 1], [], []>} : vector<32x8xf32>, vector<8x8xf32>, vector<32x8xf32> -> vector<32x8xf32>
    %58 = arith.addf %54, %57 : vector<32x8xf32>
    %c2_38 = arith.constant 2 : index
    %c0_39 = arith.constant 0 : index
    %c0_40 = arith.constant 0 : index
    %59 = vector.load %arg5[%c2_38, %c0_39, %c0_40] : memref<3x8x8xf32, #tpu.memory_space<vmem>>, vector<1x8x8xf32>
    %60 = vector.shape_cast %59 : vector<1x8x8xf32> to vector<8x8xf32>
    %cst_41 = arith.constant dense<0.000000e+00> : vector<32x8xf32>
    %61 = tpu.matmul %51, %60, %cst_41 {dimension_numbers = #tpu.dot_dimension_numbers<[1], [0], [0], [1], [0, 0, 1, 1], [], []>} : vector<32x8xf32>, vector<8x8xf32>, vector<32x8xf32> -> vector<32x8xf32>
    %62 = arith.addf %58, %61 : vector<32x8xf32>
    %63 = vector.broadcast %44 : vector<1x8xf32> to vector<32x8xf32>
    %64 = arith.addf %62, %63 : vector<32x8xf32>
    %cst_42 = arith.constant dense<0.000000e+00> : vector<8xf32>
    %65 = vector.multi_reduction <add>, %64, %cst_42 [0] : vector<32x8xf32> to vector<8xf32>
    %66 = vector.shape_cast %65 : vector<8xf32> to vector<1x8xf32>
    %cst_43 = arith.constant 3.200000e+01 : f32
    %67 = vector.broadcast %cst_43 : f32 to vector<1x8xf32>
    %68 = arith.divf %66, %67 : vector<1x8xf32>
    %69 = vector.broadcast %68 : vector<1x8xf32> to vector<32x8xf32>
    %70 = arith.subf %64, %69 : vector<32x8xf32>
    %71 = arith.mulf %70, %70 : vector<32x8xf32>
    %cst_44 = arith.constant dense<0.000000e+00> : vector<8xf32>
    %72 = vector.multi_reduction <add>, %71, %cst_44 [0] : vector<32x8xf32> to vector<8xf32>
    %73 = vector.shape_cast %72 : vector<8xf32> to vector<1x8xf32>
    %cst_45 = arith.constant 3.200000e+01 : f32
    %74 = vector.broadcast %cst_45 : f32 to vector<1x8xf32>
    %75 = arith.divf %73, %74 : vector<1x8xf32>
    %cst_46 = arith.constant 9.99999974E-6 : f32
    %76 = vector.broadcast %cst_46 : f32 to vector<1x8xf32>
    %77 = arith.addf %75, %76 : vector<1x8xf32>
    %78 = math.rsqrt %77 : vector<1x8xf32>
    %79 = vector.broadcast %78 : vector<1x8xf32> to vector<32x8xf32>
    %80 = arith.mulf %70, %79 : vector<32x8xf32>
    %81 = vector.broadcast %45 : vector<1x8xf32> to vector<32x8xf32>
    %82 = arith.mulf %80, %81 : vector<32x8xf32>
    %83 = vector.broadcast %46 : vector<1x8xf32> to vector<32x8xf32>
    %84 = arith.addf %82, %83 : vector<32x8xf32>
    %cst_47 = arith.constant 0.000000e+00 : f32
    %85 = vector.broadcast %cst_47 : f32 to vector<32x8xf32>
    %86 = arith.maximumf %84, %85 : vector<32x8xf32>
    %c0_48 = arith.constant 0 : index
    %c0_49 = arith.constant 0 : index
    %87 = vector.load %arg11[%c0_48, %c0_49] : memref<32x8xf32, #tpu.memory_space<vmem>>, vector<32x8xf32>
    tpu.vector_store %arg11[%c0_48, %c0_49], %86 {strides = array<i32>} : memref<32x8xf32, #tpu.memory_space<vmem>>, vector<32x8xf32>,
    %cst_50 = arith.constant 0.000000e+00 : f32
    %88 = vector.broadcast %cst_50 : f32 to vector<2x6xf32>
    %89 = vector.extract_strided_slice %86 {offsets = [0, 0], sizes = [2, 8], strides = [1, 1]} : vector<32x8xf32> to vector<2x8xf32>
    %c0_51 = arith.constant 0 : index
    %c0_52 = arith.constant 0 : index
    %c0_53 = arith.constant 0 : index
    %90 = vector.load %arg9[%c0_51, %c0_52, %c0_53] : memref<16x8x6xf32, #tpu.memory_space<vmem>>, vector<1x8x6xf32>
    %91 = vector.shape_cast %90 : vector<1x8x6xf32> to vector<8x6xf32>
    %cst_54 = arith.constant dense<0.000000e+00> : vector<2x6xf32>
    %92 = tpu.matmul %89, %91, %cst_54 {dimension_numbers = #tpu.dot_dimension_numbers<[1], [0], [0], [1], [0, 0, 1, 1], [], []>} : vector<2x8xf32>, vector<8x6xf32>, vector<2x6xf32> -> vector<2x6xf32>
    %93 = arith.addf %88, %92 : vector<2x6xf32>
    %94 = vector.extract_strided_slice %86 {offsets = [2, 0], sizes = [2, 8], strides = [1, 1]} : vector<32x8xf32> to vector<2x8xf32>
    %c1_55 = arith.constant 1 : index
    %c0_56 = arith.constant 0 : index
    %c0_57 = arith.constant 0 : index
    %95 = vector.load %arg9[%c1_55, %c0_56, %c0_57] : memref<16x8x6xf32, #tpu.memory_space<vmem>>, vector<1x8x6xf32>
    %96 = vector.shape_cast %95 : vector<1x8x6xf32> to vector<8x6xf32>
    %cst_58 = arith.constant dense<0.000000e+00> : vector<2x6xf32>
    %97 = tpu.matmul %94, %96, %cst_58 {dimension_numbers = #tpu.dot_dimension_numbers<[1], [0], [0], [1], [0, 0, 1, 1], [], []>} : vector<2x8xf32>, vector<8x6xf32>, vector<2x6xf32> -> vector<2x6xf32>
    %98 = arith.addf %93, %97 : vector<2x6xf32>
    %99 = vector.extract_strided_slice %86 {offsets = [4, 0], sizes = [2, 8], strides = [1, 1]} : vector<32x8xf32> to vector<2x8xf32>
    %c2_59 = arith.constant 2 : index
    %c0_60 = arith.constant 0 : index
    %c0_61 = arith.constant 0 : index
    %100 = vector.load %arg9[%c2_59, %c0_60, %c0_61] : memref<16x8x6xf32, #tpu.memory_space<vmem>>, vector<1x8x6xf32>
    %101 = vector.shape_cast %100 : vector<1x8x6xf32> to vector<8x6xf32>
    %cst_62 = arith.constant dense<0.000000e+00> : vector<2x6xf32>
    %102 = tpu.matmul %99, %101, %cst_62 {dimension_numbers = #tpu.dot_dimension_numbers<[1], [0], [0], [1], [0, 0, 1, 1], [], []>} : vector<2x8xf32>, vector<8x6xf32>, vector<2x6xf32> -> vector<2x6xf32>
    %103 = arith.addf %98, %102 : vector<2x6xf32>
    %104 = vector.extract_strided_slice %86 {offsets = [6, 0], sizes = [2, 8], strides = [1, 1]} : vector<32x8xf32> to vector<2x8xf32>
    %c3 = arith.constant 3 : index
    %c0_63 = arith.constant 0 : index
    %c0_64 = arith.constant 0 : index
    %105 = vector.load %arg9[%c3, %c0_63, %c0_64] : memref<16x8x6xf32, #tpu.memory_space<vmem>>, vector<1x8x6xf32>
    %106 = vector.shape_cast %105 : vector<1x8x6xf32> to vector<8x6xf32>
    %cst_65 = arith.constant dense<0.000000e+00> : vector<2x6xf32>
    %107 = tpu.matmul %104, %106, %cst_65 {dimension_numbers = #tpu.dot_dimension_numbers<[1], [0], [0], [1], [0, 0, 1, 1], [], []>} : vector<2x8xf32>, vector<8x6xf32>, vector<2x6xf32> -> vector<2x6xf32>
    %108 = arith.addf %103, %107 : vector<2x6xf32>
    %109 = vector.extract_strided_slice %86 {offsets = [8, 0], sizes = [2, 8], strides = [1, 1]} : vector<32x8xf32> to vector<2x8xf32>
    %c4 = arith.constant 4 : index
    %c0_66 = arith.constant 0 : index
    %c0_67 = arith.constant 0 : index
    %110 = vector.load %arg9[%c4, %c0_66, %c0_67] : memref<16x8x6xf32, #tpu.memory_space<vmem>>, vector<1x8x6xf32>
    %111 = vector.shape_cast %110 : vector<1x8x6xf32> to vector<8x6xf32>
    %cst_68 = arith.constant dense<0.000000e+00> : vector<2x6xf32>
    %112 = tpu.matmul %109, %111, %cst_68 {dimension_numbers = #tpu.dot_dimension_numbers<[1], [0], [0], [1], [0, 0, 1, 1], [], []>} : vector<2x8xf32>, vector<8x6xf32>, vector<2x6xf32> -> vector<2x6xf32>
    %113 = arith.addf %108, %112 : vector<2x6xf32>
    %114 = vector.extract_strided_slice %86 {offsets = [10, 0], sizes = [2, 8], strides = [1, 1]} : vector<32x8xf32> to vector<2x8xf32>
    %c5 = arith.constant 5 : index
    %c0_69 = arith.constant 0 : index
    %c0_70 = arith.constant 0 : index
    %115 = vector.load %arg9[%c5, %c0_69, %c0_70] : memref<16x8x6xf32, #tpu.memory_space<vmem>>, vector<1x8x6xf32>
    %116 = vector.shape_cast %115 : vector<1x8x6xf32> to vector<8x6xf32>
    %cst_71 = arith.constant dense<0.000000e+00> : vector<2x6xf32>
    %117 = tpu.matmul %114, %116, %cst_71 {dimension_numbers = #tpu.dot_dimension_numbers<[1], [0], [0], [1], [0, 0, 1, 1], [], []>} : vector<2x8xf32>, vector<8x6xf32>, vector<2x6xf32> -> vector<2x6xf32>
    %118 = arith.addf %113, %117 : vector<2x6xf32>
    %119 = vector.extract_strided_slice %86 {offsets = [12, 0], sizes = [2, 8], strides = [1, 1]} : vector<32x8xf32> to vector<2x8xf32>
    %c6 = arith.constant 6 : index
    %c0_72 = arith.constant 0 : index
    %c0_73 = arith.constant 0 : index
    %120 = vector.load %arg9[%c6, %c0_72, %c0_73] : memref<16x8x6xf32, #tpu.memory_space<vmem>>, vector<1x8x6xf32>
    %121 = vector.shape_cast %120 : vector<1x8x6xf32> to vector<8x6xf32>
    %cst_74 = arith.constant dense<0.000000e+00> : vector<2x6xf32>
    %122 = tpu.matmul %119, %121, %cst_74 {dimension_numbers = #tpu.dot_dimension_numbers<[1], [0], [0], [1], [0, 0, 1, 1], [], []>} : vector<2x8xf32>, vector<8x6xf32>, vector<2x6xf32> -> vector<2x6xf32>
    %123 = arith.addf %118, %122 : vector<2x6xf32>
    %124 = vector.extract_strided_slice %86 {offsets = [14, 0], sizes = [2, 8], strides = [1, 1]} : vector<32x8xf32> to vector<2x8xf32>
    %c7 = arith.constant 7 : index
    %c0_75 = arith.constant 0 : index
    %c0_76 = arith.constant 0 : index
    %125 = vector.load %arg9[%c7, %c0_75, %c0_76] : memref<16x8x6xf32, #tpu.memory_space<vmem>>, vector<1x8x6xf32>
    %126 = vector.shape_cast %125 : vector<1x8x6xf32> to vector<8x6xf32>
    %cst_77 = arith.constant dense<0.000000e+00> : vector<2x6xf32>
    %127 = tpu.matmul %124, %126, %cst_77 {dimension_numbers = #tpu.dot_dimension_numbers<[1], [0], [0], [1], [0, 0, 1, 1], [], []>} : vector<2x8xf32>, vector<8x6xf32>, vector<2x6xf32> -> vector<2x6xf32>
    %128 = arith.addf %123, %127 : vector<2x6xf32>
    %129 = vector.extract_strided_slice %86 {offsets = [16, 0], sizes = [2, 8], strides = [1, 1]} : vector<32x8xf32> to vector<2x8xf32>
    %c8 = arith.constant 8 : index
    %c0_78 = arith.constant 0 : index
    %c0_79 = arith.constant 0 : index
    %130 = vector.load %arg9[%c8, %c0_78, %c0_79] : memref<16x8x6xf32, #tpu.memory_space<vmem>>, vector<1x8x6xf32>
    %131 = vector.shape_cast %130 : vector<1x8x6xf32> to vector<8x6xf32>
    %cst_80 = arith.constant dense<0.000000e+00> : vector<2x6xf32>
    %132 = tpu.matmul %129, %131, %cst_80 {dimension_numbers = #tpu.dot_dimension_numbers<[1], [0], [0], [1], [0, 0, 1, 1], [], []>} : vector<2x8xf32>, vector<8x6xf32>, vector<2x6xf32> -> vector<2x6xf32>
    %133 = arith.addf %128, %132 : vector<2x6xf32>
    %134 = vector.extract_strided_slice %86 {offsets = [18, 0], sizes = [2, 8], strides = [1, 1]} : vector<32x8xf32> to vector<2x8xf32>
    %c9 = arith.constant 9 : index
    %c0_81 = arith.constant 0 : index
    %c0_82 = arith.constant 0 : index
    %135 = vector.load %arg9[%c9, %c0_81, %c0_82] : memref<16x8x6xf32, #tpu.memory_space<vmem>>, vector<1x8x6xf32>
    %136 = vector.shape_cast %135 : vector<1x8x6xf32> to vector<8x6xf32>
    %cst_83 = arith.constant dense<0.000000e+00> : vector<2x6xf32>
    %137 = tpu.matmul %134, %136, %cst_83 {dimension_numbers = #tpu.dot_dimension_numbers<[1], [0], [0], [1], [0, 0, 1, 1], [], []>} : vector<2x8xf32>, vector<8x6xf32>, vector<2x6xf32> -> vector<2x6xf32>
    %138 = arith.addf %133, %137 : vector<2x6xf32>
    %139 = vector.extract_strided_slice %86 {offsets = [20, 0], sizes = [2, 8], strides = [1, 1]} : vector<32x8xf32> to vector<2x8xf32>
    %c10 = arith.constant 10 : index
    %c0_84 = arith.constant 0 : index
    %c0_85 = arith.constant 0 : index
    %140 = vector.load %arg9[%c10, %c0_84, %c0_85] : memref<16x8x6xf32, #tpu.memory_space<vmem>>, vector<1x8x6xf32>
    %141 = vector.shape_cast %140 : vector<1x8x6xf32> to vector<8x6xf32>
    %cst_86 = arith.constant dense<0.000000e+00> : vector<2x6xf32>
    %142 = tpu.matmul %139, %141, %cst_86 {dimension_numbers = #tpu.dot_dimension_numbers<[1], [0], [0], [1], [0, 0, 1, 1], [], []>} : vector<2x8xf32>, vector<8x6xf32>, vector<2x6xf32> -> vector<2x6xf32>
    %143 = arith.addf %138, %142 : vector<2x6xf32>
    %144 = vector.extract_strided_slice %86 {offsets = [22, 0], sizes = [2, 8], strides = [1, 1]} : vector<32x8xf32> to vector<2x8xf32>
    %c11 = arith.constant 11 : index
    %c0_87 = arith.constant 0 : index
    %c0_88 = arith.constant 0 : index
    %145 = vector.load %arg9[%c11, %c0_87, %c0_88] : memref<16x8x6xf32, #tpu.memory_space<vmem>>, vector<1x8x6xf32>
    %146 = vector.shape_cast %145 : vector<1x8x6xf32> to vector<8x6xf32>
    %cst_89 = arith.constant dense<0.000000e+00> : vector<2x6xf32>
    %147 = tpu.matmul %144, %146, %cst_89 {dimension_numbers = #tpu.dot_dimension_numbers<[1], [0], [0], [1], [0, 0, 1, 1], [], []>} : vector<2x8xf32>, vector<8x6xf32>, vector<2x6xf32> -> vector<2x6xf32>
    %148 = arith.addf %143, %147 : vector<2x6xf32>
    %149 = vector.extract_strided_slice %86 {offsets = [24, 0], sizes = [2, 8], strides = [1, 1]} : vector<32x8xf32> to vector<2x8xf32>
    %c12 = arith.constant 12 : index
    %c0_90 = arith.constant 0 : index
    %c0_91 = arith.constant 0 : index
    %150 = vector.load %arg9[%c12, %c0_90, %c0_91] : memref<16x8x6xf32, #tpu.memory_space<vmem>>, vector<1x8x6xf32>
    %151 = vector.shape_cast %150 : vector<1x8x6xf32> to vector<8x6xf32>
    %cst_92 = arith.constant dense<0.000000e+00> : vector<2x6xf32>
    %152 = tpu.matmul %149, %151, %cst_92 {dimension_numbers = #tpu.dot_dimension_numbers<[1], [0], [0], [1], [0, 0, 1, 1], [], []>} : vector<2x8xf32>, vector<8x6xf32>, vector<2x6xf32> -> vector<2x6xf32>
    %153 = arith.addf %148, %152 : vector<2x6xf32>
    %154 = vector.extract_strided_slice %86 {offsets = [26, 0], sizes = [2, 8], strides = [1, 1]} : vector<32x8xf32> to vector<2x8xf32>
    %c13 = arith.constant 13 : index
    %c0_93 = arith.constant 0 : index
    %c0_94 = arith.constant 0 : index
    %155 = vector.load %arg9[%c13, %c0_93, %c0_94] : memref<16x8x6xf32, #tpu.memory_space<vmem>>, vector<1x8x6xf32>
    %156 = vector.shape_cast %155 : vector<1x8x6xf32> to vector<8x6xf32>
    %cst_95 = arith.constant dense<0.000000e+00> : vector<2x6xf32>
    %157 = tpu.matmul %154, %156, %cst_95 {dimension_numbers = #tpu.dot_dimension_numbers<[1], [0], [0], [1], [0, 0, 1, 1], [], []>} : vector<2x8xf32>, vector<8x6xf32>, vector<2x6xf32> -> vector<2x6xf32>
    %158 = arith.addf %153, %157 : vector<2x6xf32>
    %159 = vector.extract_strided_slice %86 {offsets = [28, 0], sizes = [2, 8], strides = [1, 1]} : vector<32x8xf32> to vector<2x8xf32>
    %c14 = arith.constant 14 : index
    %c0_96 = arith.constant 0 : index
    %c0_97 = arith.constant 0 : index
    %160 = vector.load %arg9[%c14, %c0_96, %c0_97] : memref<16x8x6xf32, #tpu.memory_space<vmem>>, vector<1x8x6xf32>
    %161 = vector.shape_cast %160 : vector<1x8x6xf32> to vector<8x6xf32>
    %cst_98 = arith.constant dense<0.000000e+00> : vector<2x6xf32>
    %162 = tpu.matmul %159, %161, %cst_98 {dimension_numbers = #tpu.dot_dimension_numbers<[1], [0], [0], [1], [0, 0, 1, 1], [], []>} : vector<2x8xf32>, vector<8x6xf32>, vector<2x6xf32> -> vector<2x6xf32>
    %163 = arith.addf %158, %162 : vector<2x6xf32>
    %164 = vector.extract_strided_slice %86 {offsets = [30, 0], sizes = [2, 8], strides = [1, 1]} : vector<32x8xf32> to vector<2x8xf32>
    %c15 = arith.constant 15 : index
    %c0_99 = arith.constant 0 : index
    %c0_100 = arith.constant 0 : index
    %165 = vector.load %arg9[%c15, %c0_99, %c0_100] : memref<16x8x6xf32, #tpu.memory_space<vmem>>, vector<1x8x6xf32>
    %166 = vector.shape_cast %165 : vector<1x8x6xf32> to vector<8x6xf32>
    %cst_101 = arith.constant dense<0.000000e+00> : vector<2x6xf32>
    %167 = tpu.matmul %164, %166, %cst_101 {dimension_numbers = #tpu.dot_dimension_numbers<[1], [0], [0], [1], [0, 0, 1, 1], [], []>} : vector<2x8xf32>, vector<8x6xf32>, vector<2x6xf32> -> vector<2x6xf32>
    %168 = arith.addf %163, %167 : vector<2x6xf32>
    %c0_102 = arith.constant 0 : index
    %c0_103 = arith.constant 0 : index
    %169 = vector.load %arg10[%c0_102, %c0_103] : memref<6x24xf32, #tpu.memory_space<vmem>>, vector<6x24xf32>
    %cst_104 = arith.constant dense<0.000000e+00> : vector<2x24xf32>
    %170 = tpu.matmul %168, %169, %cst_104 {dimension_numbers = #tpu.dot_dimension_numbers<[1], [0], [0], [1], [0, 0, 1, 1], [], []>} : vector<2x6xf32>, vector<6x24xf32>, vector<2x24xf32> -> vector<2x24xf32>
    %c0_105 = arith.constant 0 : index
    %c0_106 = arith.constant 0 : index
    %171 = vector.load %arg12[%c0_105, %c0_106] : memref<2x24xf32, #tpu.memory_space<vmem>>, vector<2x24xf32>
    tpu.vector_store %arg12[%c0_105, %c0_106], %170 {strides = array<i32>} : memref<2x24xf32, #tpu.memory_space<vmem>>, vector<2x24xf32>,
    return
  }
}

</mosaic_0001>

<bundles_post_ra>
// kernel: tpu_custom_call.1
= control target key start
LH: loop header
LB: loop body
LE: loop exit
PB: predicated region body
PF: predicated region fallthrough
CT: control target
= control target key end

     0   :  { %vm84_vm0 = vcmask 1043456   ;;  %vm62_vm1 = vcmask 1045504   ;;  %vm75_vm2 = vcmask 31744   ;;  %vm52_vm3 = vcmask 1041408   ;;  %s1350_s0 = inlined_call_operand.vmem [shape: f32[32,4], index: 0, kind: input, shape index: {}]   ;;  %s1351_s1 = inlined_call_operand.vmem [shape: f32[3,4,8], index: 1, kind: input, shape index: {}]   ;;  %s1352_s2 = inlined_call_operand.vmem [shape: f32[1,8], index: 2, kind: input, shape index: {}]   ;;  %s1353_s3 = inlined_call_operand.vmem [shape: f32[1,8], index: 3, kind: input, shape index: {}]   ;;  %s1354_s4 = inlined_call_operand.vmem [shape: f32[1,8], index: 4, kind: input, shape index: {}]   ;;  %s1355_s5 = inlined_call_operand.vmem [shape: f32[3,8,8], index: 5, kind: input, shape index: {}]   ;;  %s1356_s6 = inlined_call_operand.vmem [shape: f32[1,8], index: 6, kind: input, shape index: {}]   ;;  %s1357_s7 = inlined_call_operand.vmem [shape: f32[1,8], index: 7, kind: input, shape index: {}]   ;;  %s1358_s8 = inlined_call_operand.vmem [shape: f32[1,8], index: 8, kind: input, shape index: {}]   ;;  %s1359_s9 = inlined_call_operand.vmem [shape: f32[16,8,6], index: 9, kind: input, shape index: {}]   ;;  %s1360_s10 = inlined_call_operand.vmem [shape: f32[6,24], index: 10, kind: input, shape index: {}]   ;;  %s1361_s11 = inlined_call_operand.vmem [shape: f32[32,8], index: 11, kind: output, shape index: {0}]   ;;  %s1362_s12 = inlined_call_operand.hbm [shape: f32[2,24], index: 12, kind: output, shape index: {1}]  }
   0x1   :  { %v990_v0 = vld [vmem:[%s1351_s1 + $0x8] sm:$0xf]  ;;  %v41_v1 = vld [vmem:[%s1350_s0] sm:$0xff]  ;;  %v43_v8 = vld [vmem:[%s1350_s0 + $0x10] sm:$0xff] }
   0x2   :  { %v42_v2 = vld [vmem:[%s1350_s0 + $0x8] sm:$0xff]  ;;  %991 = vmatpush.msk.msra.mxu2 %vm84_vm0, %v990_v0  ;;  %v63_v3 = vrot.slane %v41_v1, 2  ;;  %v979_v5 = vld [vmem:[%s1351_s1 + $0x4] sm:$0xf]  ;;  %v72_v6 = vld [vmem:[%s1351_s1] sm:$0xf] }
   0x3   :  { %v64_v4 = vrot.slane %v42_v2, 2  ;;  %980 = vmatpush.msk.msra.mxu0 %vm84_vm0, %v979_v5  ;;  %v53_v7 = vrot.slane %v41_v1, 6  ;;  %985 = vmatpush.msk.msra.mxu1 %vm84_vm0, %v72_v6  ;;  %v66_v11 = vrot.slane %v43_v8, 2  ;;  %v54_v12 = vrot.slane %v42_v2, 6 }
   0x4   :  { %981 = vmatmul.msk.f32.vlgmr.msra.gmra.mxu0 %vm75_vm2, %v41_v1 }
   0x5   :  { %v65_v9 = vsel %vm62_vm1, %v63_v3, %v64_v4  ;;  %v61_v10 = vsel %vm52_vm3, 0.0, %v53_v7 }
   0x6   :  { %992 = vmatmul.msk.f32.vlgmr.msra.gmra.mxu2 %vm75_vm2, %v65_v9  ;;  %986 = vmatmul.msk.f32.vlgmr.msra.gmra.mxu1 %vm75_vm2, %v61_v10 }
   0x7   :  { %18 = vsyncpa [#allocation3], 0  ;;  %v67_v13 = vsel %vm62_vm1, %v64_v4, %v66_v11  ;;  %v55_v14 = vsel %vm52_vm3, %v53_v7, %v54_v12  ;;  %v44_v15 = vld [vmem:[%s1350_s0 + $0x18] sm:$0xff]  ;;  %v56_v17 = vrot.slane %v43_v8, 6  ;;  %v1083_v36 = vmov 32.0  }
   0x8   :  { %v68_v16 = vrot.slane %v44_v15, 2  ;;  %v58_v20 = vrot.slane %v44_v15, 6  ;;  %1051 = vrcp.f32 %v1083_v36  ;;  %v1045_v38 = vld [vmem:[%s1352_s2] ss:$0 sm:$0xff]  ;;  %vm212_vm4 = vcmask 64512  }
   0x9   :  { %v57_v19 = vsel %vm52_vm3, %v54_v12, %v56_v17  ;;  %vm930_vm12 = vcmask 48128   ;;  %vm957_vm13 = vcmask 189440  }
   0xa   :  { %v69_v18 = vsel %vm62_vm1, %v66_v11, %v68_v16  ;;  %v71_v21 = vsel %vm62_vm1, %v68_v16, 0.0  ;;  %v59_v22 = vsel %vm52_vm3, %v56_v17, %v58_v20 }
   0xc   :  { %982 = vmatmul.msk.f32.gmra.mxu0 %vm75_vm2, %v42_v2 }
   0xe   :  { %993 = vmatmul.msk.f32.gmra.mxu2 %vm75_vm2, %v67_v13  ;;  %987 = vmatmul.msk.f32.gmra.mxu1 %vm75_vm2, %v55_v14  ;;  %v1052_v46 = vpop.eup %1051 }
   0xf   :  { %v227_v52 = vmul.f32 32.0, %v1052_v46  ;;  %vm231_vm5 = vweird.f32 %v1052_v46 }
  0x11   :  { %v228_v57 = vsub.f32 1.0, %v227_v52 }
  0x13   :  { %v229_v60 = vmul.f32 %v1052_v46, %v228_v57 }
  0x14   :  { %983 = vmatmul.msk.f32.gmra.mxu0 %vm75_vm2, %v43_v8 }
  0x15   :  { %v230_v63 = vadd.f32 %v1052_v46, %v229_v60 }
  0x16   :  { %994 = vmatmul.msk.f32.gmra.mxu2 %vm75_vm2, %v69_v18  ;;  %988 = vmatmul.msk.f32.gmra.mxu1 %vm75_vm2, %v57_v19 }
  0x17   :  { %v1201_v2 = vsel %vm231_vm5, %v1052_v46, %v230_v63 }
  0x1c   :  { %984 = vmatmul.msk.f32.gmra.mxu0 %vm75_vm2, %v44_v15 }
  0x1e   :  { %995 = vmatmul.msk.f32.gmra.mxu2 %vm75_vm2, %v71_v21  ;;  %989 = vmatmul.msk.f32.gmra.mxu1 %vm75_vm2, %v59_v22 }
  0x81   :  { %v105_v23 = vpop.f32.mrf.mxu0 }
  0x83   :  { %v146_v24 = vpop.f32.mrf.mxu1 }
  0x84   :  { %v147_v32 = vadd.f32 %v146_v24, %v105_v23  ;;  %v314_v24 = vld [vmem:[%s1355_s5] sm:$0xff] }
  0x85   :  { %378 = vmatpush.msrb.mxu0 %v314_v24 }
  0x89   :  { %v189_v25 = vpop.f32.mrf.mxu2  ;;  %v108_v26 = vpop.f32.mrf.mxu0 }
  0x8a   :  { %v201_v37 = vadd.f32 %v189_v25, %v147_v32  ;;  %v1005_v25 = vld [vmem:[%s1355_s5 + $0x10] sm:$0xff] }
  0x8b   :  { %v149_v27 = vpop.f32.mrf.mxu1  ;;  %418 = vmatpush.msrb.mxu1 %v1005_v25 }
  0x8c   :  { %v150_v30 = vadd.f32 %v149_v27, %v108_v26  ;;  %v208_v43 = vadd.f32 %v1045_v38, %v201_v37  ;;  %v996_v26 = vld [vmem:[%s1355_s5 + $0x8] sm:$0xff]  ;;  %v1046_v37 = vld [vmem:[%s1353_s3] ss:$0 sm:$0xff] }
  0x8d   :  { %340 = vmatpush.msra.mxu3 %v996_v26 }
  0x8e   :  { %v213_v49 = vsel %vm212_vm4, %v208_v43, 0.0 }
  0x91   :  { %v192_v28 = vpop.f32.mrf.mxu2  ;;  %v111_v29 = vpop.f32.mrf.mxu0 }
  0x92   :  { %v202_v34 = vadd.f32 %v192_v28, %v150_v30 }
  0x93   :  { %v152_v31 = vpop.f32.mrf.mxu1 }
  0x94   :  { %v153_v33 = vadd.f32 %v152_v31, %v111_v29  ;;  %v209_v41 = vadd.f32 %v1045_v38, %v202_v34 }
  0x96   :  { %v214_v47 = vsel %vm212_vm4, %v209_v41, 0.0 }
  0x97   :  { %v215_v53 = vadd.f32 %v214_v47, %v213_v49 }
  0x99   :  { %v195_v35 = vpop.f32.mrf.mxu2  ;;  %v114_v40 = vpop.f32.mrf.mxu0 }
  0x9a   :  { %v203_v39 = vadd.f32 %v195_v35, %v153_v33 }
  0x9b   :  { %v155_v42 = vpop.f32.mrf.mxu1 }
  0x9c   :  { %v210_v44 = vadd.f32 %v1045_v38, %v203_v39  ;;  %v156_v45 = vadd.f32 %v155_v42, %v114_v40 }
  0x9e   :  { %v216_v50 = vsel %vm212_vm4, %v210_v44, 0.0 }
  0x9f   :  { %v217_v55 = vadd.f32 %v216_v50, %v215_v53 }
  0xa1   :  { %v198_v48 = vpop.f32.mrf.mxu2 }
  0xa2   :  { %v204_v51 = vadd.f32 %v198_v48, %v156_v45 }
  0xa4   :  { %v211_v54 = vadd.f32 %v1045_v38, %v204_v51 }
  0xa6   :  { %v218_v56 = vsel %vm212_vm4, %v211_v54, 0.0 }
  0xa7   :  { %v219_v58 = vadd.f32 %v218_v56, %v217_v55 }
  0xa9   :  { %v220_v59 = vrot.slane %v219_v58, 4 }
  0xab   :  { %v221_v61 = vadd.f32 %v220_v59, %v219_v58 }
  0xad   :  { %v222_v62 = vrot.slane %v221_v61, 2 }
  0xaf   :  { %v223_v0 = vadd.f32 %v222_v62, %v221_v61 }
  0xb1   :  { %v224_v1 = vrot.slane %v223_v0, 1 }
  0xb3   :  { %v225_v3 = vadd.f32 %v224_v1, %v223_v0 }
  0xb5   :  { %v233_v4 = vmul.f32 %v1201_v2, %v225_v3 }
  0xb7   :  { %v234_v5 = vsub.f32 %v208_v43, %v233_v4  ;;  %v235_v6 = vsub.f32 %v209_v41, %v233_v4  ;;  %v236_v7 = vsub.f32 %v210_v44, %v233_v4  ;;  %v237_v8 = vsub.f32 %v211_v54, %v233_v4  ;;  %v1047_v41 = vld [vmem:[%s1354_s4] ss:$0 sm:$0xff] }
  0xb9   :  { %v238_v9 = vmul.f32 %v234_v5, %v234_v5  ;;  %v239_v10 = vmul.f32 %v235_v6, %v235_v6  ;;  %v240_v11 = vmul.f32 %v236_v7, %v236_v7  ;;  %v241_v12 = vmul.f32 %v237_v8, %v237_v8 }
  0xbb   :  { %v242_v13 = vsel %vm212_vm4, %v238_v9, 0.0  ;;  %v243_v14 = vsel %vm212_vm4, %v239_v10, 0.0  ;;  %v245_v16 = vsel %vm212_vm4, %v240_v11, 0.0  ;;  %v247_v18 = vsel %vm212_vm4, %v241_v12, 0.0 }
  0xbc   :  { %v244_v15 = vadd.f32 %v243_v14, %v242_v13 }
  0xbe   :  { %v246_v17 = vadd.f32 %v245_v16, %v244_v15 }
  0xc0   :  { %v248_v19 = vadd.f32 %v247_v18, %v246_v17 }
  0xc2   :  { %v249_v20 = vrot.slane %v248_v19, 4 }
  0xc4   :  { %v250_v21 = vadd.f32 %v249_v20, %v248_v19 }
  0xc6   :  { %v251_v22 = vrot.slane %v250_v21, 2 }
  0xc8   :  { %v252_v23 = vadd.f32 %v251_v22, %v250_v21 }
  0xca   :  { %v253_v27 = vrot.slane %v252_v23, 1 }
  0xcc   :  { %v254_v28 = vadd.f32 %v253_v27, %v252_v23  ;;  %v1048_v23 = vld [vmem:[%s1356_s6] ss:$0 sm:$0xff] }
  0xce   :  { %v255_v29 = vmul.f32 %v254_v28, %v1201_v2 }
  0xd0   :  { %v256_v30 = vadd.f32 1e-05, %v255_v29 }
  0xd2   :  { %1053 = vrsqrt.f32 %v256_v30  ;;  %vm263_vm7 = vweird.f32 %v256_v30 }
  0xd8   :  { %v1054_v31 = vpop.eup %1053 }
  0xd9   :  { %v258_v32 = vmul.f32 %v1054_v31, %v256_v30  ;;  %vm264_vm6 = vweird.f32 %v1054_v31 }
  0xda   :  { %vm265_vm8 = vmor %vm263_vm7, %vm264_vm6 }
  0xdb   :  { %v259_v33 = vmul.f32 %v1054_v31, %v258_v32 }
  0xdd   :  { %v260_v34 = vmul.f32 0.5, %v259_v33 }
  0xdf   :  { %v261_v35 = vsub.f32 1.5, %v260_v34 }
  0xe1   :  { %v262_v36 = vmul.f32 %v1054_v31, %v261_v35 }
  0xe3   :  { %v266_v38 = vsel %vm265_vm8, %v1054_v31, %v262_v36 }
  0xe4   :  { %v268_v39 = vmul.f32 %v266_v38, %v235_v6  ;;  %v269_v40 = vmul.f32 %v266_v38, %v236_v7  ;;  %v267_v42 = vmul.f32 %v266_v38, %v234_v5  ;;  %v270_v48 = vmul.f32 %v266_v38, %v237_v8 }
  0xe6   :  { %v274_v43 = vmul.f32 %v1046_v37, %v267_v42  ;;  %v275_v44 = vmul.f32 %v1046_v37, %v268_v39  ;;  %v276_v45 = vmul.f32 %v1046_v37, %v269_v40  ;;  %v277_v55 = vmul.f32 %v1046_v37, %v270_v48 }
  0xe8   :  { %v281_v46 = vadd.f32 %v1047_v41, %v274_v43  ;;  %v282_v47 = vadd.f32 %v1047_v41, %v275_v44  ;;  %v283_v51 = vadd.f32 %v1047_v41, %v276_v45  ;;  %v284_v59 = vadd.f32 %v1047_v41, %v277_v55 }
  0xea   :  { %v285_v49 = vmax.f32 %v281_v46, 0.0  ;;  %v286_v50 = vmax.f32 %v282_v47, 0.0  ;;  %v287_v58 = vmax.f32 %v283_v51, 0.0  ;;  %v288_v0 = vmax.f32 %v284_v59, 0.0 }
  0xec   :  { %997 = vmatmul.msk.f32.vlgmr.msra.gmra.mxu3 %vm212_vm4, %v285_v49  ;;  %v296_v52 = vrot.slane %v285_v49, 6  ;;  %v305_v53 = vrot.slane %v285_v49, 2  ;;  %v306_v54 = vrot.slane %v286_v50, 2  ;;  %v297_v60 = vrot.slane %v286_v50, 6 }
  0xed   :  { %v308_v61 = vrot.slane %v287_v58, 2  ;;  %v299_v1 = vrot.slane %v287_v58, 6  ;;  %v310_v3 = vrot.slane %v288_v0, 2  ;;  %v301_v6 = vrot.slane %v288_v0, 6 }
  0xee   :  { %v304_v56 = vsel %vm52_vm3, 0.0, %v296_v52  ;;  %v307_v57 = vsel %vm62_vm1, %v305_v53, %v306_v54  ;;  %v298_v62 = vsel %vm52_vm3, %v296_v52, %v297_v60 }
  0xef   :  { %1001 = vmatmul.msk.f32.vlgmr.msrb.gmra.mxu0 %vm212_vm4, %v304_v56  ;;  %1006 = vmatmul.msk.f32.vlgmr.msrb.gmra.mxu1 %vm212_vm4, %v307_v57  ;;  %v309_v63 = vsel %vm62_vm1, %v306_v54, %v308_v61  ;;  %v300_v4 = vsel %vm52_vm3, %v297_v60, %v299_v1  ;;  %v311_v5 = vsel %vm62_vm1, %v308_v61, %v310_v3  ;;  %v313_v8 = vsel %vm62_vm1, %v310_v3, 0.0 }
  0xf0   :  { %v302_v7 = vsel %vm52_vm3, %v299_v1, %v301_v6  ;;  %v1010_v6 = vld [vmem:[%s1359_s9 + $0x8] sm:$0xff] }
  0xf1   :  { %538 = vmatpush.msrb.mxu2 %v1010_v6 }
  0xf4   :  { %998 = vmatmul.msk.f32.gmra.mxu3 %vm212_vm4, %v286_v50 }
  0xf7   :  { %1002 = vmatmul.msk.f32.gmra.mxu0 %vm212_vm4, %v298_v62  ;;  %1007 = vmatmul.msk.f32.gmra.mxu1 %vm212_vm4, %v309_v63 }
  0xfc   :  { %999 = vmatmul.msk.f32.gmra.mxu3 %vm212_vm4, %v287_v58 }
  0xff   :  { %1003 = vmatmul.msk.f32.gmra.mxu0 %vm212_vm4, %v300_v4  ;;  %1008 = vmatmul.msk.f32.gmra.mxu1 %vm212_vm4, %v311_v5 }
 0x104   :  { %1000 = vmatmul.msk.f32.gmra.mxu3 %vm212_vm4, %v288_v0 }
 0x107   :  { %1004 = vmatmul.msk.f32.gmra.mxu0 %vm212_vm4, %v302_v7  ;;  %1009 = vmatmul.msk.f32.gmra.mxu1 %vm212_vm4, %v313_v8  ;;  %v516_v7 = vld [vmem:[%s1359_s9] sm:$0xff] }
 0x108   :  { %v1025_v8 = vld [vmem:[%s1359_s9 + $0x40] sm:$0xff]  ;;  %560 = vmatpush.msrb.mxu3 %v516_v7 }
 0x109   :  { %741 = vmatpush.msra.mxu0 %v1025_v8 }
 0x16c   :  { %v380_v9 = vpop.f32.mrf.mxu0  ;;  %v420_v10 = vpop.f32.mrf.mxu1 }
 0x16f   :  { %v342_v11 = vpop.f32.mrf.mxu3 }
 0x170   :  { %v381_v17 = vadd.f32 %v380_v9, %v342_v11  ;;  %v1013_v11 = vld [vmem:[%s1359_s9 + $0x10] sm:$0xff] }
 0x171   :  { %585 = vmatpush.msra.mxu2 %v1013_v11 }
 0x172   :  { %v432_v22 = vadd.f32 %v420_v10, %v381_v17  ;;  %v1027_v10 = vld [vmem:[%s1359_s9 + $0x48] sm:$0xff] }
 0x173   :  { %767 = vmatpush.msra.mxu1 %v1027_v10 }
 0x174   :  { %v383_v12 = vpop.f32.mrf.mxu0  ;;  %v423_v13 = vpop.f32.mrf.mxu1  ;;  %v439_v26 = vadd.f32 %v1048_v23, %v432_v22 }
 0x176   :  { %v443_v33 = vsel %vm212_vm4, %v439_v26, 0.0 }
 0x177   :  { %v345_v14 = vpop.f32.mrf.mxu3 }
 0x178   :  { %v384_v15 = vadd.f32 %v383_v12, %v345_v14  ;;  %v1015_v12 = vld [vmem:[%s1359_s9 + $0x18] sm:$0xff]  ;;  %v1035_v14 = vld [vmem:[%s1359_s9 + $0x68] sm:$0xff] }
 0x179   :  { %611 = vmatpush.msra.mxu3 %v1015_v12  ;;  %871 = vmatpush.msrb.mxu1 %v1035_v14 }
 0x17a   :  { %v433_v20 = vadd.f32 %v423_v13, %v384_v15  ;;  %v1033_v13 = vld [vmem:[%s1359_s9 + $0x60] sm:$0xff] }
 0x17b   :  { %845 = vmatpush.msrb.mxu0 %v1033_v13 }
 0x17c   :  { %v386_v16 = vpop.f32.mrf.mxu0  ;;  %v426_v18 = vpop.f32.mrf.mxu1  ;;  %v440_v25 = vadd.f32 %v1048_v23, %v433_v20 }
 0x17e   :  { %v444_v30 = vsel %vm212_vm4, %v440_v25, 0.0 }
 0x17f   :  { %v348_v19 = vpop.f32.mrf.mxu3  ;;  %v445_v36 = vadd.f32 %v444_v30, %v443_v33 }
 0x180   :  { %v387_v21 = vadd.f32 %v386_v16, %v348_v19 }
 0x182   :  { %v434_v24 = vadd.f32 %v426_v18, %v387_v21  ;;  %v1049_v21 = vld [vmem:[%s1357_s7] ss:$0 sm:$0xff]  ;;  %s968_s7 = sshll.u32 %s1362_s12, 4  ;;  %s969_s7 = int_to_ptr.hbm [resolvable:$true] %s968_s7 }
 0x184   :  { %v441_v27 = vadd.f32 %v1048_v23, %v434_v24  ;;  %v389_v28 = vpop.f32.mrf.mxu0  ;;  %v429_v32 = vpop.f32.mrf.mxu1 }
 0x186   :  { %v446_v34 = vsel %vm212_vm4, %v441_v27, 0.0 }
 0x187   :  { %v351_v29 = vpop.f32.mrf.mxu3  ;;  %v447_v38 = vadd.f32 %v446_v34, %v445_v36 }
 0x188   :  { %v390_v31 = vadd.f32 %v389_v28, %v351_v29 }
 0x18a   :  { %v435_v35 = vadd.f32 %v429_v32, %v390_v31 }
 0x18c   :  { %v442_v37 = vadd.f32 %v1048_v23, %v435_v35 }
 0x18e   :  { %v448_v39 = vsel %vm212_vm4, %v442_v37, 0.0 }
 0x18f   :  { %v449_v40 = vadd.f32 %v448_v39, %v447_v38  ;;  %v1019_v39 = vld [vmem:[%s1359_s9 + $0x28] sm:$0xff] }
 0x191   :  { %v450_v41 = vrot.slane %v449_v40, 4 }
 0x193   :  { %v451_v42 = vadd.f32 %v450_v41, %v449_v40 }
 0x195   :  { %v452_v43 = vrot.slane %v451_v42, 2 }
 0x197   :  { %v453_v44 = vadd.f32 %v452_v43, %v451_v42  ;;  %v1017_v43 = vld [vmem:[%s1359_s9 + $0x20] sm:$0xff] }
 0x199   :  { %v454_v45 = vrot.slane %v453_v44, 1 }
 0x19b   :  { %v455_v46 = vadd.f32 %v454_v45, %v453_v44  ;;  %v1023_v45 = vld [vmem:[%s1359_s9 + $0x38] sm:$0xff] }
 0x19d   :  { %v456_v47 = vmul.f32 %v455_v46, %v1201_v2 }
 0x19f   :  { %v457_v48 = vsub.f32 %v439_v26, %v456_v47  ;;  %v458_v49 = vsub.f32 %v440_v25, %v456_v47  ;;  %v459_v50 = vsub.f32 %v441_v27, %v456_v47  ;;  %v460_v51 = vsub.f32 %v442_v37, %v456_v47  ;;  %v1050_v25 = vld [vmem:[%s1358_s8] ss:$0 sm:$0xff] }
 0x1a1   :  { %v461_v52 = vmul.f32 %v457_v48, %v457_v48  ;;  %v462_v53 = vmul.f32 %v458_v49, %v458_v49  ;;  %v463_v54 = vmul.f32 %v459_v50, %v459_v50  ;;  %v464_v55 = vmul.f32 %v460_v51, %v460_v51 }
 0x1a3   :  { %v465_v56 = vsel %vm212_vm4, %v461_v52, 0.0  ;;  %v466_v57 = vsel %vm212_vm4, %v462_v53, 0.0  ;;  %v468_v59 = vsel %vm212_vm4, %v463_v54, 0.0  ;;  %v470_v61 = vsel %vm212_vm4, %v464_v55, 0.0  ;;  %v1039_v53 = vld [vmem:[%s1359_s9 + $0x78] sm:$0xff]  ;;  %v1037_v55 = vld [vmem:[%s1359_s9 + $0x70] sm:$0xff] }
 0x1a4   :  { %v467_v58 = vadd.f32 %v466_v57, %v465_v56 }
 0x1a6   :  { %v469_v60 = vadd.f32 %v468_v59, %v467_v58 }
 0x1a8   :  { %v471_v62 = vadd.f32 %v470_v61, %v469_v60 }
 0x1aa   :  { %v472_v63 = vrot.slane %v471_v62, 4 }
 0x1ac   :  { %v473_v0 = vadd.f32 %v472_v63, %v471_v62  ;;  %v929_v62 = vld [vmem:[%s1360_s10] sm:$0x3f]  ;;  %s1084_s10 = smov [#allocation2]  }
 0x1ad   :  { %s966_s20 = sshll.u32 %s1084_s10, 4  ;;  %s967_s20 = int_to_ptr.vmem [resolvable:$true] %s966_s20 }
 0x1ae   :  { %v474_v1 = vrot.slane %v473_v0, 2 }
 0x1b0   :  { %v475_v3 = vadd.f32 %v474_v1, %v473_v0 }
 0x1b2   :  { %v476_v4 = vrot.slane %v475_v3, 1 }
 0x1b4   :  { %v477_v5 = vadd.f32 %v476_v4, %v475_v3 }
 0x1b6   :  { %v478_v9 = vmul.f32 %v477_v5, %v1201_v2 }
 0x1b8   :  { %v479_v2 = vadd.f32 1e-05, %v478_v9 }
 0x1ba   :  { %1055 = vrsqrt.f32 %v479_v2  ;;  %vm486_vm10 = vweird.f32 %v479_v2 }
 0x1c0   :  { %v1056_v15 = vpop.eup %1055 }
 0x1c1   :  { %v481_v16 = vmul.f32 %v1056_v15, %v479_v2  ;;  %vm487_vm9 = vweird.f32 %v1056_v15 }
 0x1c2   :  { %vm488_vm11 = vmor %vm486_vm10, %vm487_vm9 }
 0x1c3   :  { %v482_v17 = vmul.f32 %v1056_v15, %v481_v16 }
 0x1c5   :  { %v483_v18 = vmul.f32 0.5, %v482_v17 }
 0x1c7   :  { %v484_v19 = vsub.f32 1.5, %v483_v18 }
 0x1c9   :  { %v485_v20 = vmul.f32 %v1056_v15, %v484_v19 }
 0x1cb   :  { %v489_v22 = vsel %vm488_vm11, %v1056_v15, %v485_v20 }
 0x1cc   :  { %v491_v23 = vmul.f32 %v489_v22, %v458_v49  ;;  %v493_v24 = vmul.f32 %v489_v22, %v460_v51  ;;  %v490_v26 = vmul.f32 %v489_v22, %v457_v48  ;;  %v492_v27 = vmul.f32 %v489_v22, %v459_v50  ;;  %v1021_v48 = vld [vmem:[%s1359_s9 + $0x30] sm:$0xff]  ;;  %v1031_v50 = vld [vmem:[%s1359_s9 + $0x58] sm:$0xff] }
 0x1cd   :  { %v1029_v51 = vld [vmem:[%s1359_s9 + $0x50] sm:$0xff] }
 0x1ce   :  { %v498_v28 = vmul.f32 %v1049_v21, %v491_v23  ;;  %v500_v29 = vmul.f32 %v1049_v21, %v493_v24  ;;  %v497_v30 = vmul.f32 %v1049_v21, %v490_v26  ;;  %v499_v31 = vmul.f32 %v1049_v21, %v492_v27 }
 0x1d0   :  { %v505_v32 = vadd.f32 %v1050_v25, %v498_v28  ;;  %v504_v33 = vadd.f32 %v1050_v25, %v497_v30  ;;  %v506_v34 = vadd.f32 %v1050_v25, %v499_v31  ;;  %v507_v35 = vadd.f32 %v1050_v25, %v500_v29 }
 0x1d2   :  { %v509_v36 = vmax.f32 %v505_v32, 0.0  ;;  %v508_v37 = vmax.f32 %v504_v33, 0.0  ;;  %v510_v38 = vmax.f32 %v506_v34, 0.0  ;;  %v511_v40 = vmax.f32 %v507_v35, 0.0 }
 0x1d4   :  { %513 = vst.msk [vmem:[%s1361_s11 + $0x8] sm:$0xff] %vm212_vm4, %v509_v36  ;;  %1012 = vmatmul.msk.f32.vlgmr.msrb.gmra.mxu3 %vm212_vm4, %v508_v37  ;;  %1026 = vmatmul.msk.f32.vlgmr.msra.gmra.mxu0 %vm212_vm4, %v510_v38  ;;  %v520_v41 = vrot.slane %v508_v37, 2  ;;  %v749_v42 = vrot.slane %v510_v38, 2  ;;  %v593_v44 = vrot.slane %v508_v37, 6  ;;  %v567_v46 = vrot.slane %v508_v37, 4 }
 0x1d5   :  { %512 = vst.msk [vmem:[%s1361_s11] sm:$0xff] %vm212_vm4, %v508_v37  ;;  %663 = vmatpush.msrb.mxu3 %v1019_v39  ;;  %v853_v47 = vrot.slane %v511_v40, 2  ;;  %v645_v49 = vrot.slane %v509_v36, 2  ;;  %v697_v52 = vrot.slane %v509_v36, 6  ;;  %v671_v54 = vrot.slane %v509_v36, 4  ;;  %1041 = vmatpush.msk.msra.mxu0 %vm62_vm1, %v929_v62 }
 0x1d6   :  { %514 = vst.msk [vmem:[%s1361_s11 + $0x10] sm:$0xff] %vm212_vm4, %v510_v38  ;;  %1011 = vmatmul.msk.f32.vlgmr.msrb.gmra.mxu2 %vm212_vm4, %v520_v41  ;;  %1028 = vmatmul.msk.f32.vlgmr.msra.gmra.mxu1 %vm212_vm4, %v749_v42  ;;  %v801_v56 = vrot.slane %v510_v38, 6  ;;  %v775_v57 = vrot.slane %v510_v38, 4  ;;  %v905_v58 = vrot.slane %v511_v40, 6  ;;  %v879_v59 = vrot.slane %v511_v40, 4 }
 0x1d7   :  { %515 = vst.msk [vmem:[%s1361_s11 + $0x18] sm:$0xff] %vm212_vm4, %v511_v40  ;;  %637 = vmatpush.msrb.mxu2 %v1017_v43 }
 0x1dc   :  { %1016 = vmatmul.msk.f32.vlgmr.msra.gmra.mxu3 %vm212_vm4, %v593_v44  ;;  %1034 = vmatmul.msk.f32.vlgmr.msrb.gmra.mxu0 %vm212_vm4, %v511_v40 }
 0x1dd   :  { %715 = vmatpush.msra.mxu3 %v1023_v45 }
 0x1de   :  { %1014 = vmatmul.msk.f32.vlgmr.msra.gmra.mxu2 %vm212_vm4, %v567_v46  ;;  %1036 = vmatmul.msk.f32.vlgmr.msrb.gmra.mxu1 %vm212_vm4, %v853_v47 }
 0x1df   :  { %689 = vmatpush.msra.mxu2 %v1021_v48 }
 0x1e4   :  { %1020 = vmatmul.msk.f32.vlgmr.msrb.gmra.mxu3 %vm212_vm4, %v645_v49 }
 0x1e5   :  { %819 = vmatpush.msrb.mxu3 %v1031_v50 }
 0x1e6   :  { %1018 = vmatmul.msk.f32.vlgmr.msrb.gmra.mxu2 %vm212_vm4, %v509_v36 }
 0x1e7   :  { %793 = vmatpush.msrb.mxu2 %v1029_v51 }
 0x1ec   :  { %1024 = vmatmul.msk.f32.vlgmr.msra.gmra.mxu3 %vm212_vm4, %v697_v52 }
 0x1ed   :  { %923 = vmatpush.msra.mxu3 %v1039_v53 }
 0x1ee   :  { %1022 = vmatmul.msk.f32.vlgmr.msra.gmra.mxu2 %vm212_vm4, %v671_v54 }
 0x1ef   :  { %897 = vmatpush.msra.mxu2 %v1037_v55 }
 0x1f4   :  { %1032 = vmatmul.msk.f32.vlgmr.msrb.gmra.mxu3 %vm212_vm4, %v801_v56 }
 0x1f6   :  { %1030 = vmatmul.msk.f32.vlgmr.msrb.gmra.mxu2 %vm212_vm4, %v775_v57 }
 0x1fc   :  { %1040 = vmatmul.msk.f32.vlgmr.msra.gmra.mxu3 %vm212_vm4, %v905_v58 }
 0x1fe   :  { %1038 = vmatmul.msk.f32.vlgmr.msra.gmra.mxu2 %vm212_vm4, %v879_v59 }
 0x251   :  { %v743_v12 = vpop.f32.mrf.mxu0 }
 0x253   :  { %v769_v2 = vpop.f32.mrf.mxu1 }
 0x257   :  { %v562_v60 = vpop.f32.mrf.mxu3 }
 0x259   :  { %v540_v61 = vpop.f32.mrf.mxu2  ;;  %v847_v20 = vpop.f32.mrf.mxu0 }
 0x25a   :  { %v563_v1 = vadd.f32 %v562_v60, %v540_v61 }
 0x25b   :  { %v873_v22 = vpop.f32.mrf.mxu1 }
 0x25f   :  { %v613_v63 = vpop.f32.mrf.mxu3 }
 0x261   :  { %v587_v0 = vpop.f32.mrf.mxu2 }
 0x262   :  { %v590_v3 = vadd.f32 %v587_v0, %v563_v1 }
 0x264   :  { %v616_v6 = vadd.f32 %v613_v63, %v590_v3 }
 0x267   :  { %v665_v4 = vpop.f32.mrf.mxu3 }
 0x269   :  { %v639_v5 = vpop.f32.mrf.mxu2 }
 0x26a   :  { %v642_v7 = vadd.f32 %v639_v5, %v616_v6 }
 0x26c   :  { %v668_v9 = vadd.f32 %v665_v4, %v642_v7 }
 0x26f   :  { %v717_v8 = vpop.f32.mrf.mxu3 }
 0x271   :  { %v691_v10 = vpop.f32.mrf.mxu2 }
 0x272   :  { %v694_v11 = vadd.f32 %v691_v10, %v668_v9 }
 0x274   :  { %v720_v13 = vadd.f32 %v717_v8, %v694_v11 }
 0x276   :  { %v746_v14 = vadd.f32 %v743_v12, %v720_v13 }
 0x277   :  { %v821_v16 = vpop.f32.mrf.mxu3 }
 0x278   :  { %v772_v15 = vadd.f32 %v769_v2, %v746_v14 }
 0x279   :  { %v795_v17 = vpop.f32.mrf.mxu2 }
 0x27a   :  { %v798_v18 = vadd.f32 %v795_v17, %v772_v15 }
 0x27c   :  { %v824_v19 = vadd.f32 %v821_v16, %v798_v18 }
 0x27e   :  { %v850_v21 = vadd.f32 %v847_v20, %v824_v19 }
 0x27f   :  { %v925_v26 = vpop.f32.mrf.mxu3 }
 0x280   :  { %v876_v23 = vadd.f32 %v873_v22, %v850_v21 }
 0x281   :  { %v899_v24 = vpop.f32.mrf.mxu2 }
 0x282   :  { %v902_v25 = vadd.f32 %v899_v24, %v876_v23 }
 0x284   :  { %v928_v27 = vadd.f32 %v925_v26, %v902_v25 }
 0x286   :  { %1042 = vmatmul.msk.f32.vlgmr.msra.gmra.mxu0 %vm930_vm12, %v928_v27 }
 0x303   :  { %v954_v28 = vpop.f32.mrf.mxu0 }
 0x304   :  { %958 = vst.msk [vmem:[#allocation2] sm:$0x3] %vm957_vm13, %v954_v28 }
 0x305   :  { %971 = dma.vmem_to_hbm [thread:$0]  %s967_s20, 32, %s969_s7, [#allocation3]  }
 0x306   :  { %1081 = dma.done.wait [#allocation3], 32  }
 0x307   :  { %1082 = vsyncadd [#allocation3], 4294967264 }
 0x308   :  { %978 = vsyncpa [#allocation3], 1 }

</bundles_post_ra>
